<compile_context>
chip_gen: v5e
topology: v5e:2x2
jax: 0.10.0
libtpu: 0.0.40
codegen_flags: <defaults>
</compile_context>

<pallas_src>
import functools

import jax
import jax.numpy as jnp
from jax.experimental import pallas as pl
from jax.experimental.pallas import tpu as pltpu


def _cdiv(a, b):
    return -(-a // b)


def _round_down_128(x):
    return (x // 128) * 128


def _vmem_capacity_bytes(fallback=64 << 20):
    """Physical VMEM per TensorCore; conservative fallback = v7x's 64 MiB."""
    try:
        info = pltpu.get_tpu_info()
        cap = getattr(info, "vmem_capacity_bytes", None)
        if cap:
            return int(cap)
    except Exception:
        pass
    return fallback


# ----------------------------- Pallas kernel --------------------------------
def _head_kernel(x_ref, wc_ref, bc_ref, wr_ref, br_ref, cls_ref, reg_ref, *,
                 compute_dtype):
    """Fused cls+reg 1x1-conv tile for one (image, HW-tile) grid point.

    x_ref  : (1, Cin, THW)   activation tile in its native dtype (cast here)
    wc_ref : (Ccls, Cin)     cls weights (compute_dtype)
    bc_ref : (Ccls, 1)       cls bias (f32)
    wr_ref : (Creg, Cin)     reg weights (compute_dtype)
    br_ref : (Creg, 1)       reg bias (f32)
    cls_ref: (1, Ccls, THW)  cls output tile, lane-dense along THW
    reg_ref: (1, Creg, THW)  reg output tile, lane-dense along THW
    """
    # Single VMEM load of the activation tile, reused by both heads; cast to
    # the bf16 MXU compute dtype in-kernel (no wrapper-side cast pass).
    x = x_ref[0].astype(compute_dtype)
    cls = jnp.dot(wc_ref[...], x, preferred_element_type=jnp.float32) + bc_ref[...]
    reg = jnp.dot(wr_ref[...], x, preferred_element_type=jnp.float32) + br_ref[...]
    cls_ref[0] = cls.astype(cls_ref.dtype)
    reg_ref[0] = reg.astype(reg_ref.dtype)


def _pick_hw_tile(n_batch, hw, cin, c_out, x_bytes, out_bytes, w_bytes,
                  thw_request, vmem_cap):
    """Choose the HW-tile width and the compiler VMEM limit."""
    budget = int(0.6 * vmem_cap)

    def footprint(t):
        # x tile + both output tiles, double-buffered by the BlockSpec pipeline.
        io = 2 * t * (cin * x_bytes + c_out * out_bytes)
        # Weights + biases (block index is constant across the grid; they are
        # still double-buffered here -- see TODO on pl.Buffered(1) below).
        wb = 2 * c_out * (cin * w_bytes + 4)
        return io + wb

    thw = min(thw_request, hw)
    if thw < hw:
        thw = max(128, _round_down_128(thw))          # lane-dense stores
    while thw > 128 and footprint(thw) > budget:      # shrink to fit VMEM
        thw = max(128, _round_down_128(thw // 2))
    # v7x megacore: make sure the "parallel" grid has >= 2 steps when possible.
    if n_batch * _cdiv(hw, thw) < 2 and hw >= 256:
        thw = max(128, _round_down_128(hw // 2))

    # Clamp the limit per generation (never exceed 75% of physical VMEM).
    vmem_limit = int(min(max(2 * footprint(thw), 32 << 20), int(0.75 * vmem_cap)))
    return thw, vmem_limit


def _anchor_head_level(x, w_cls, b_cls, w_reg, b_reg, *,
                       out_dtype=jnp.bfloat16, compute_dtype=jnp.bfloat16,
                       thw_request=4096):
    """x: (N, Cin, HW) channel-major (NCHW flattened).

    Returns (cls (N, Ccls, HW), reg (N, Creg, HW)) directly in NCHW
    channel-major layout -- no activation transpose/concat and no output
    slice/transpose afterwards.
    """
    N, Cin, HW = x.shape
    c_cls = w_cls.shape[0]
    c_reg = w_reg.shape[0]

    x_bytes = jnp.dtype(x.dtype).itemsize
    w_bytes = jnp.dtype(w_cls.dtype).itemsize
    out_bytes = jnp.dtype(out_dtype).itemsize
    vmem_cap = _vmem_capacity_bytes()
    thw, vmem_limit = _pick_hw_tile(N, HW, Cin, c_cls + c_reg, x_bytes,
                                    out_bytes, w_bytes, thw_request, vmem_cap)

    grid = (N, _cdiv(HW, thw))
    kernel = functools.partial(_head_kernel, compute_dtype=compute_dtype)

    # TODO(synk): once pl.Buffered(1) is validated on the target JAX version,
    # single-buffer the weight/bias specs (their block index is constant) to
    # free a little VMEM headroom.
    cls, reg = pl.pallas_call(
        kernel,
        out_shape=(jax.ShapeDtypeStruct((N, c_cls, HW), out_dtype),
                   jax.ShapeDtypeStruct((N, c_reg, HW), out_dtype)),
        grid_spec=pltpu.PrefetchScalarGridSpec(
            num_scalar_prefetch=0,
            grid=grid,
            in_specs=[
                pl.BlockSpec((1, Cin, thw), lambda n, j: (n, 0, j)),
                pl.BlockSpec((c_cls, Cin), lambda n, j: (0, 0)),
                pl.BlockSpec((c_cls, 1), lambda n, j: (0, 0)),
                pl.BlockSpec((c_reg, Cin), lambda n, j: (0, 0)),
                pl.BlockSpec((c_reg, 1), lambda n, j: (0, 0)),
            ],
            out_specs=[
                pl.BlockSpec((1, c_cls, thw), lambda n, j: (n, 0, j)),
                pl.BlockSpec((1, c_reg, thw), lambda n, j: (n, 0, j)),
            ],
        ),
        compiler_params=pltpu.CompilerParams(
            dimension_semantics=("parallel", "parallel"),
            vmem_limit_bytes=vmem_limit,
        ),
    )(x, w_cls, b_cls, w_reg, b_reg)
    return cls, reg


# ----------------------------- AnchorHead (JAX) ------------------------------
class AnchorHeadPallas:
    """JAX/Pallas re-implementation of AnchorHead.forward (1x1 conv heads)."""

    def __init__(self, num_classes, in_channels, feat_channels=256,
                 anchor_generator=None, use_sigmoid_cls=True,
                 compute_dtype=jnp.bfloat16, out_dtype=jnp.bfloat16, key=None):
        if anchor_generator is None:
            anchor_generator = dict(scales=[8, 16, 32],
                                    ratios=[0.5, 1.0, 2.0],
                                    strides=[4, 8, 16, 32, 64])
        self.num_classes = num_classes
        self.in_channels = in_channels
        self.feat_channels = feat_channels
        self.use_sigmoid_cls = use_sigmoid_cls
        self.cls_out_channels = num_classes if use_sigmoid_cls else num_classes + 1
        # AnchorGenerator: num_base_anchors per location = len(scales)*len(ratios)
        self.num_anchors = (len(anchor_generator["scales"])
                            * len(anchor_generator["ratios"]))
        self.compute_dtype = compute_dtype
        # bf16 outputs by default (halves write-back of this HBM-bound op);
        # set out_dtype=jnp.float32 if the downstream loss needs full precision.
        self.out_dtype = out_dtype

        self.c_cls = self.num_anchors * self.cls_out_channels
        self.c_reg = self.num_anchors * 4

        # normal_init(std=0.01, bias=0) as in init_weights(); weights kept in
        # the exact Conv2d (Cout, Cin) orientation -> no transpose anywhere.
        key = jax.random.PRNGKey(0) if key is None else key
        k1, k2 = jax.random.split(key)
        self.w_cls = (0.01 * jax.random.normal(
            k1, (self.c_cls, in_channels), jnp.float32)).astype(compute_dtype)
        self.w_reg = (0.01 * jax.random.normal(
            k2, (self.c_reg, in_channels), jnp.float32)).astype(compute_dtype)
        self.b_cls = jnp.zeros((self.c_cls, 1), jnp.float32)
        self.b_reg = jnp.zeros((self.c_reg, 1), jnp.float32)

    def forward_single(self, x):
        """x: (N, C, H, W) -> (cls (N, Ccls, H, W), reg (N, Creg, H, W))."""
        N, C, H, W = x.shape
        assert C == self.in_channels
        cls, reg = _anchor_head_level(
            x.reshape(N, C, H * W),             # free reshape, stays NCHW-major
            self.w_cls, self.b_cls, self.w_reg, self.b_reg,
            out_dtype=self.out_dtype, compute_dtype=self.compute_dtype)
        return cls.reshape(N, self.c_cls, H, W), reg.reshape(N, self.c_reg, H, W)

    def forward(self, feats):
        """feats: tuple of NCHW tensors. Returns (cls_scores list, bbox_preds list)."""
        cls_scores, bbox_preds = [], []
        for x in feats:
            c, r = self.forward_single(x)
            cls_scores.append(c)
            bbox_preds.append(r)
        return cls_scores, bbox_preds
    # TODO(synk): get_bboxes (anchor grid decode + NMS) is test-time
    # postprocessing, not part of forward(); omitted.


# ------------------------------- reference -----------------------------------
def _ref_forward_single(x, w, b):
    """Plain-JAX 1x1 conv matching the kernel numerics (bf16 operands, f32 acc)."""
    x32 = x.astype(w.dtype).astype(jnp.float32)
    w32 = w.astype(jnp.float32)
    out = jnp.einsum("oc,nchw->nohw", w32, x32,
                     preferred_element_type=jnp.float32)
    return out + b.reshape(1, -1, 1, 1)


if __name__ == "__main__":
    key = jax.random.PRNGKey(0)
    head = AnchorHeadPallas(num_classes=4, in_channels=8,
                            key=jax.random.PRNGKey(1))

    # Exercise the bias-add path (normal_init zeroes the bias; the kernel must
    # still add whatever bias is present).
    kb1, kb2 = jax.random.split(jax.random.PRNGKey(2))
    head.b_cls = 0.1 * jax.random.normal(kb1, (head.c_cls, 1), jnp.float32)
    head.b_reg = 0.1 * jax.random.normal(kb2, (head.c_reg, 1), jnp.float32)

    # Small feature pyramid: 3 levels, NCHW, batch=2, channels=8.
    sizes = [(16, 16), (8, 8), (4, 4)]
    feats = []
    for (h, w) in sizes:
        key, sub = jax.random.split(key)
        feats.append(jax.random.normal(sub, (2, 8, h, w), dtype=jnp.float32))
    feats = tuple(feats)

    cls_scores, bbox_preds = head.forward(feats)
    jax.block_until_ready(cls_scores)
    jax.block_until_ready(bbox_preds)

    ok = True
    for x, c, r in zip(feats, cls_scores, bbox_preds):
        c_ref = _ref_forward_single(x, head.w_cls, head.b_cls)
        r_ref = _ref_forward_single(x, head.w_reg, head.b_reg)
        # bf16 outputs -> compare in f32 with bf16-appropriate tolerances.
        ok &= bool(jnp.allclose(c.astype(jnp.float32), c_ref, rtol=2e-2, atol=2e-3))
        ok &= bool(jnp.allclose(r.astype(jnp.float32), r_ref, rtol=2e-2, atol=2e-3))
        assert c.shape == (x.shape[0], head.num_anchors * head.cls_out_channels,
                           x.shape[2], x.shape[3])
        assert r.shape == (x.shape[0], head.num_anchors * 4,
                           x.shape[2], x.shape[3])

    print("KERNEL_OK" if ok else "KERNEL_MISMATCH")
</pallas_src>

<mosaic_0001>
module attributes {stable_mosaic.version = 11 : i64} {
  func.func @_head_kernel(%arg0: i32, %arg1: i32, %arg2: memref<1x8x256xf32, #tpu.memory_space<vmem>>, %arg3: memref<36x8xbf16, #tpu.memory_space<vmem>>, %arg4: memref<36x1xf32, #tpu.memory_space<vmem>>, %arg5: memref<36x8xbf16, #tpu.memory_space<vmem>>, %arg6: memref<36x1xf32, #tpu.memory_space<vmem>>, %arg7: memref<1x36x256xbf16, #tpu.memory_space<vmem>>, %arg8: memref<1x36x256xbf16, #tpu.memory_space<vmem>>) attributes {dimension_semantics = [#tpu.dimension_semantics<parallel>, #tpu.dimension_semantics<parallel>], iteration_bounds = array<i64: 2, 1>, scalar_prefetch = 0 : i64, scratch_operands = 0 : i64, tpu.core_type = #tpu.core_type<tc>, window_params = [{transform_indices = @transform_0, window_bounds = array<i64: 1, 8, 256>}, {pipeline_mode = #tpu.pipeline_mode<synchronous>, transform_indices = @transform_1, window_bounds = array<i64: 36, 8>}, {pipeline_mode = #tpu.pipeline_mode<synchronous>, transform_indices = @transform_2, window_bounds = array<i64: 36, 1>}, {pipeline_mode = #tpu.pipeline_mode<synchronous>, transform_indices = @transform_3, window_bounds = array<i64: 36, 8>}, {pipeline_mode = #tpu.pipeline_mode<synchronous>, transform_indices = @transform_4, window_bounds = array<i64: 36, 1>}, {transform_indices = @transform_5, window_bounds = array<i64: 1, 36, 256>}, {transform_indices = @transform_6, window_bounds = array<i64: 1, 36, 256>}]} {
    %c0 = arith.constant 0 : index
    %c0_0 = arith.constant 0 : index
    %c0_1 = arith.constant 0 : index
    %0 = vector.load %arg2[%c0, %c0_0, %c0_1] : memref<1x8x256xf32, #tpu.memory_space<vmem>>, vector<1x8x256xf32>
    %1 = vector.shape_cast %0 : vector<1x8x256xf32> to vector<8x256xf32>
    %2 = arith.truncf %1 : vector<8x256xf32> to vector<8x256xbf16>
    %c0_2 = arith.constant 0 : index
    %c0_3 = arith.constant 0 : index
    %3 = vector.load %arg3[%c0_2, %c0_3] : memref<36x8xbf16, #tpu.memory_space<vmem>>, vector<36x8xbf16>
    %cst = arith.constant dense<0.000000e+00> : vector<36x256xf32>
    %4 = tpu.matmul %3, %2, %cst {dimension_numbers = #tpu.dot_dimension_numbers<[1], [0], [0], [1], [0, 0, 1, 1], [], []>} : vector<36x8xbf16>, vector<8x256xbf16>, vector<36x256xf32> -> vector<36x256xf32>
    %c0_4 = arith.constant 0 : index
    %c0_5 = arith.constant 0 : index
    %5 = vector.load %arg4[%c0_4, %c0_5] : memref<36x1xf32, #tpu.memory_space<vmem>>, vector<36x1xf32>
    %6 = vector.broadcast %5 : vector<36x1xf32> to vector<36x256xf32>
    %7 = arith.addf %4, %6 : vector<36x256xf32>
    %c0_6 = arith.constant 0 : index
    %c0_7 = arith.constant 0 : index
    %8 = vector.load %arg5[%c0_6, %c0_7] : memref<36x8xbf16, #tpu.memory_space<vmem>>, vector<36x8xbf16>
    %cst_8 = arith.constant dense<0.000000e+00> : vector<36x256xf32>
    %9 = tpu.matmul %8, %2, %cst_8 {dimension_numbers = #tpu.dot_dimension_numbers<[1], [0], [0], [1], [0, 0, 1, 1], [], []>} : vector<36x8xbf16>, vector<8x256xbf16>, vector<36x256xf32> -> vector<36x256xf32>
    %c0_9 = arith.constant 0 : index
    %c0_10 = arith.constant 0 : index
    %10 = vector.load %arg6[%c0_9, %c0_10] : memref<36x1xf32, #tpu.memory_space<vmem>>, vector<36x1xf32>
    %11 = vector.broadcast %10 : vector<36x1xf32> to vector<36x256xf32>
    %12 = arith.addf %9, %11 : vector<36x256xf32>
    %13 = arith.truncf %7 : vector<36x256xf32> to vector<36x256xbf16>
    %c0_11 = arith.constant 0 : index
    %c0_12 = arith.constant 0 : index
    %c0_13 = arith.constant 0 : index
    %14 = vector.load %arg7[%c0_11, %c0_12, %c0_13] : memref<1x36x256xbf16, #tpu.memory_space<vmem>>, vector<1x36x256xbf16>
    %15 = vector.shape_cast %14 : vector<1x36x256xbf16> to vector<36x256xbf16>
    %16 = vector.shape_cast %13 : vector<36x256xbf16> to vector<1x36x256xbf16>
    tpu.vector_store %arg7[%c0_11, %c0_12, %c0_13], %16 {strides = array<i32>} : memref<1x36x256xbf16, #tpu.memory_space<vmem>>, vector<1x36x256xbf16>,
    %17 = arith.truncf %12 : vector<36x256xf32> to vector<36x256xbf16>
    %c0_14 = arith.constant 0 : index
    %c0_15 = arith.constant 0 : index
    %c0_16 = arith.constant 0 : index
    %18 = vector.load %arg8[%c0_14, %c0_15, %c0_16] : memref<1x36x256xbf16, #tpu.memory_space<vmem>>, vector<1x36x256xbf16>
    %19 = vector.shape_cast %18 : vector<1x36x256xbf16> to vector<36x256xbf16>
    %20 = vector.shape_cast %17 : vector<36x256xbf16> to vector<1x36x256xbf16>
    tpu.vector_store %arg8[%c0_14, %c0_15, %c0_16], %20 {strides = array<i32>} : memref<1x36x256xbf16, #tpu.memory_space<vmem>>, vector<1x36x256xbf16>,
    return
  }
  func.func @transform_0(%arg0: i32, %arg1: i32) -> (i32, i32, i32) {
    %c0_i32 = arith.constant 0 : i32
    %c0_i32_0 = arith.constant 0 : i32
    return %arg0, %c0_i32, %arg1 : i32, i32, i32
  }
  func.func @transform_1(%arg0: i32, %arg1: i32) -> (i32, i32) {
    %c0_i32 = arith.constant 0 : i32
    %c0_i32_0 = arith.constant 0 : i32
    %c0_i32_1 = arith.constant 0 : i32
    return %c0_i32, %c0_i32_0 : i32, i32
  }
  func.func @transform_2(%arg0: i32, %arg1: i32) -> (i32, i32) {
    %c0_i32 = arith.constant 0 : i32
    %c0_i32_0 = arith.constant 0 : i32
    %c0_i32_1 = arith.constant 0 : i32
    return %c0_i32, %c0_i32_0 : i32, i32
  }
  func.func @transform_3(%arg0: i32, %arg1: i32) -> (i32, i32) {
    %c0_i32 = arith.constant 0 : i32
    %c0_i32_0 = arith.constant 0 : i32
    %c0_i32_1 = arith.constant 0 : i32
    return %c0_i32, %c0_i32_0 : i32, i32
  }
  func.func @transform_4(%arg0: i32, %arg1: i32) -> (i32, i32) {
    %c0_i32 = arith.constant 0 : i32
    %c0_i32_0 = arith.constant 0 : i32
    %c0_i32_1 = arith.constant 0 : i32
    return %c0_i32, %c0_i32_0 : i32, i32
  }
  func.func @transform_5(%arg0: i32, %arg1: i32) -> (i32, i32, i32) {
    %c0_i32 = arith.constant 0 : i32
    %c0_i32_0 = arith.constant 0 : i32
    return %arg0, %c0_i32, %arg1 : i32, i32, i32
  }
  func.func @transform_6(%arg0: i32, %arg1: i32) -> (i32, i32, i32) {
    %c0_i32 = arith.constant 0 : i32
    %c0_i32_0 = arith.constant 0 : i32
    return %arg0, %c0_i32, %arg1 : i32, i32, i32
  }
}

</mosaic_0001>

<bundles_post_ra>
// kernel: tpu_custom_call.1
= control target key start
LH: loop header
LB: loop body
LE: loop exit
PB: predicated region body
PF: predicated region fallthrough
CT: control target
= control target key end

     0   :  { %s824_s21 = smov 0   ;;  %s826_s22 = smov 0   ;;  %s938_s0 = inlined_call_operand.vmem [shape: f32[2,8,256], index: 0, kind: input, shape index: {}]   ;;  %s939_s1 = inlined_call_operand.vmem [shape: bf16[36,8], index: 1, kind: input, shape index: {}]   ;;  %s940_s2 = inlined_call_operand.vmem [shape: f32[36,1], index: 2, kind: input, shape index: {}]   ;;  %s941_s3 = inlined_call_operand.vmem [shape: bf16[36,8], index: 3, kind: input, shape index: {}]   ;;  %s942_s4 = inlined_call_operand.vmem [shape: f32[36,1], index: 4, kind: input, shape index: {}]   ;;  %s943_s5 = inlined_call_operand.vmem [shape: bf16[2,36,256], index: 5, kind: output, shape index: {0}]   ;;  %s944_s6 = inlined_call_operand.vmem [shape: bf16[2,36,256], index: 6, kind: output, shape index: {1}]  }
   0x1   :  { %s828_s23 = smov 0  }
   0x2 LB: > { %s29_s24 = sadd.s32 1, %s782_s22  ;;  %p695_p0 = scmp.ge.s32.totalorder %s786_s23, 1  ;;  %s786_s23 = sphi %s828_s23, %s17_s23   ;;  %s782_s22 = sphi %s826_s22, %s946_s22   ;;  %s778_s21 = sphi %s824_s21, %s945_s21  }
   0x3   : > { %p31_p1 = scmp.ge.s32.totalorder %s29_s24, 2  ;;  %p238_p2 = scmp.lt.s32.totalorder %s786_s23, 3 }
   0x5   : > { %s948_s24 = smov (%p31_p1, %s29_s24), 0  ;;  %p239_p3 = pnand %p695_p0, %p238_p2 }
   0x6   : > { %p286_p4 = scmp.lt.s32.totalorder (!%p239_p3), %s778_s21, 1 }
   0x7   : > { %242 = sbr.rel (%p239_p3) target bundleno = 196 (0xc4), region = 40 }
   0xc   : > { %v788_v0 = vmov 0   ;;  %v325_v1 = vld [vmem:[%s940_s2] sm:$0xff]  ;;  %s950_s21 = smov (!%p286_p4, %s778_s21), 1  ;;  %v327_v2 = vld [vmem:[%s940_s2 + $0x10] sm:$0xff]  ;;  %vm378_vm0 = vcmask 1043456   ;;  %v326_v10 = vld [vmem:[%s940_s2 + $0x8] sm:$0xff] }
   0xd   : > { %761 = vset.pattern.permute.xlu0 %v788_v0  ;;  %762 = vset.pattern.permute.xlu1 %v788_v0  ;;  %s730_s29 = sshll.u32 %s950_s21, 4  ;;  %v731_v9 = vld [vmem:[%s939_s1] sm:$0xff]  ;;  %v328_v11 = vld [vmem:[%s940_s2 + $0x18] sm:$0xff]  ;;  %vm368_vm1 = vcmask 64512   ;;  %v437_v14 = vld [vmem:[%s942_s4 + $0x8] sm:$0xff]  ;;  %s735_s17 = smul.u32 40, %s950_s21 }
   0xe   : > { %332 = vperm.xlu0 %761, %v325_v1   ;;  %763 = vset.pattern.permute.xlu2 %v788_v0  ;;  %s293_s8 = scalar_lea.vmem %s938_s0, %s730_s29  ;;  %v733_v12 = vld [vmem:[%s941_s3] sm:$0xff]  ;;  %v438_v15 = vld [vmem:[%s942_s4 + $0x10] sm:$0xff]  ;;  %v732_v17 = vld [vmem:[%s939_s1 + $0x8] sm:$0xff] }
   0xf   : > { %342 = vperm.xlu1 %762, %v327_v2   ;;  %v316_v3 = vld [vmem:[%s293_s8] sm:$0xff]  ;;  %v317_v4 = vld [vmem:[%s293_s8 + $0x8] sm:$0xff]  ;;  %v439_v20 = vld [vmem:[%s942_s4 + $0x18] sm:$0xff]  ;;  %s912_s20 = scalar_lea.vmem %s943_s5, %s735_s17  ;;  %s918_s26 = scalar_lea.vmem %s944_s6, %s735_s17 }
  0x10   : > { %v318_v5 = vpack.c.bf16 %v316_v3, %v316_v3  ;;  %v319_v6 = vpack.c.bf16 %v317_v4, %v317_v4  ;;  %v329_v13 = vld [vmem:[%s940_s2 + $0x20] sm:$0xf]  ;;  %v734_v19 = vld [vmem:[%s941_s3 + $0x8] sm:$0xff]  ;;  %v324_v21 = vld [vmem:[%s939_s1 + $0x10] sm:$0x3] }
  0x11   : > { %352 = vperm.xlu2 %763, %v329_v13   ;;  %v436_v16 = vld [vmem:[%s942_s4] sm:$0xff]  ;;  %v435_v22 = vld [vmem:[%s941_s3 + $0x10] sm:$0x3]  ;;  %v364_v23 = vunpack.c.l.b16 %v324_v21 }
  0x12   : > { %v380_v7 = vsel %vm378_vm0, %v318_v5, 0  ;;  %v383_v8 = vsel %vm378_vm0, %v319_v6, 0  ;;  %v440_v18 = vld [vmem:[%s942_s4 + $0x20] sm:$0xf]  ;;  %v475_v24 = vunpack.c.l.b16 %v435_v22 }
  0x13   : > { %392 = vmatpush.bf16.msra.mxu0 %v380_v7  ;;  %415 = vmatpush.bf16.msra.mxu1 %v383_v8  ;;  %v367_v25 = vpack.c.b16 %v364_v23, %v364_v23 }
  0x14   : > { %495 = vmatpush.bf16.msra.mxu2 %v380_v7  ;;  %518 = vmatpush.bf16.msra.mxu3 %v383_v8  ;;  %v478_v26 = vpack.c.b16 %v475_v24, %v475_v24 }
  0x16   : > { %337 = vperm.xlu0 %761, %v326_v10   ;;  %708 = vmatmul.msk.bf16.vlgmr.msra.gmra.mxu0 %vm368_vm1, %v731_v9 }
  0x17   : > { %347 = vperm.xlu1 %762, %v328_v11   ;;  %711 = vmatmul.msk.bf16.vlgmr.msra.gmra.mxu1 %vm368_vm1, %v731_v9 }
  0x18   : > { %722 = vmatmul.msk.bf16.vlgmr.msra.gmra.mxu2 %vm368_vm1, %v733_v12  ;;  %725 = vmatmul.msk.bf16.vlgmr.msra.gmra.mxu3 %vm368_vm1, %v733_v12 }
  0x19   : > { %443 = vperm.xlu2 %763, %v436_v16  }
  0x1e   : > { %448 = vperm.xlu0 %761, %v437_v14  }
  0x1f   : > { %453 = vperm.xlu1 %762, %v438_v15  }
  0x21   : > { %458 = vperm.xlu2 %763, %v439_v20  }
  0x26   : > { %463 = vperm.xlu0 %761, %v440_v18   ;;  %709 = vmatmul.msk.bf16.gmra.mxu0 %vm368_vm1, %v732_v17 }
  0x27   : > { %712 = vmatmul.msk.bf16.gmra.mxu1 %vm368_vm1, %v732_v17 }
  0x28   : > { %723 = vmatmul.msk.bf16.gmra.mxu2 %vm368_vm1, %v734_v19  ;;  %726 = vmatmul.msk.bf16.gmra.mxu3 %vm368_vm1, %v734_v19 }
  0x36   : > { %710 = vmatmul.msk.bf16.gmra.mxu0 %vm368_vm1, %v367_v25 }
  0x37   : > { %713 = vmatmul.msk.bf16.gmra.mxu1 %vm368_vm1, %v367_v25 }
  0x38   : > { %724 = vmatmul.msk.bf16.gmra.mxu2 %vm368_vm1, %v478_v26  ;;  %727 = vmatmul.msk.bf16.gmra.mxu3 %vm368_vm1, %v478_v26 }
  0x6b   : > { %v353_v28 = vpop.permute.xlu2 %352 }
  0x73   : > { %v444_v36 = vpop.permute.xlu2 %443 }
  0x7b   : > { %v459_v6 = vpop.permute.xlu2 %458 }
  0x80   : > { %v333_v27 = vpop.permute.xlu0 %332 }
  0x81   : > { %v343_v33 = vpop.permute.xlu1 %342 }
  0x88   : > { %v338_v35 = vpop.permute.xlu0 %337 }
  0x89   : > { %v348_v47 = vpop.permute.xlu1 %347 }
  0x90   : > { %v449_v48 = vpop.permute.xlu0 %448 }
  0x91   : > { %v454_v59 = vpop.permute.xlu1 %453 }
  0x93   : > { %v394_v29 = vpop.f32.mrf.mxu0 }
  0x94   : > { %v417_v30 = vpop.f32.mrf.mxu1  ;;  %v395_v31 = vadd.f32 %v394_v29, %v333_v27 }
  0x95   : > { %v418_v32 = vadd.f32 %v417_v30, %v333_v27 }
  0x97   : > { %v534_v34 = vpack.c.bf16 %v418_v32, %v395_v31 }
  0x98   : > { %v464_v17 = vpop.permute.xlu0 %463 }
  0x99   : > { %539 = vst [vmem:[%s912_s20] sm:$0xff] %v534_v34 }
  0x9b   : > { %v497_v37 = vpop.f32.mrf.mxu2  ;;  %v520_v38 = vpop.f32.mrf.mxu3 }
  0x9c   : > { %v498_v39 = vadd.f32 %v497_v37, %v444_v36  ;;  %v521_v40 = vadd.f32 %v520_v38, %v444_v36  ;;  %v396_v41 = vpop.f32.mrf.mxu0  ;;  %v419_v42 = vpop.f32.mrf.mxu1 }
  0x9d   : > { %v397_v43 = vadd.f32 %v396_v41, %v338_v35  ;;  %v420_v44 = vadd.f32 %v419_v42, %v338_v35 }
  0x9e   : > { %v544_v45 = vpack.c.bf16 %v521_v40, %v498_v39 }
  0x9f   : > { %v535_v46 = vpack.c.bf16 %v420_v44, %v397_v43 }
  0xa0   : > { %549 = vst [vmem:[%s918_s26] sm:$0xff] %v544_v45 }
  0xa1   : > { %540 = vst [vmem:[%s912_s20 + $0x8] sm:$0xff] %v535_v46 }
  0xa3   : > { %v499_v49 = vpop.f32.mrf.mxu2  ;;  %v522_v50 = vpop.f32.mrf.mxu3 }
  0xa4   : > { %v500_v51 = vadd.f32 %v499_v49, %v449_v48  ;;  %v523_v52 = vadd.f32 %v522_v50, %v449_v48  ;;  %v399_v53 = vpop.f32.mrf.mxu0  ;;  %v422_v54 = vpop.f32.mrf.mxu1 }
  0xa5   : > { %v400_v55 = vadd.f32 %v399_v53, %v343_v33  ;;  %v423_v56 = vadd.f32 %v422_v54, %v343_v33 }
  0xa6   : > { %v545_v57 = vpack.c.bf16 %v523_v52, %v500_v51 }
  0xa7   : > { %v536_v58 = vpack.c.bf16 %v423_v56, %v400_v55 }
  0xa8   : > { %550 = vst [vmem:[%s918_s26 + $0x8] sm:$0xff] %v545_v57 }
  0xa9   : > { %541 = vst [vmem:[%s912_s20 + $0x10] sm:$0xff] %v536_v58 }
  0xab   : > { %v502_v60 = vpop.f32.mrf.mxu2  ;;  %v525_v61 = vpop.f32.mrf.mxu3 }
  0xac   : > { %v503_v62 = vadd.f32 %v502_v60, %v454_v59  ;;  %v526_v63 = vadd.f32 %v525_v61, %v454_v59  ;;  %v401_v0 = vpop.f32.mrf.mxu0  ;;  %v424_v1 = vpop.f32.mrf.mxu1 }
  0xad   : > { %v402_v2 = vadd.f32 %v401_v0, %v348_v47  ;;  %v425_v3 = vadd.f32 %v424_v1, %v348_v47 }
  0xae   : > { %v546_v4 = vpack.c.bf16 %v526_v63, %v503_v62 }
  0xaf   : > { %v537_v5 = vpack.c.bf16 %v425_v3, %v402_v2 }
  0xb0   : > { %551 = vst [vmem:[%s918_s26 + $0x10] sm:$0xff] %v546_v4 }
  0xb1   : > { %542 = vst [vmem:[%s912_s20 + $0x18] sm:$0xff] %v537_v5 }
  0xb3   : > { %v504_v7 = vpop.f32.mrf.mxu2  ;;  %v527_v8 = vpop.f32.mrf.mxu3 }
  0xb4   : > { %v505_v9 = vadd.f32 %v504_v7, %v459_v6  ;;  %v528_v10 = vadd.f32 %v527_v8, %v459_v6  ;;  %v404_v11 = vpop.f32.mrf.mxu0  ;;  %v427_v12 = vpop.f32.mrf.mxu1 }
  0xb5   : > { %v405_v13 = vadd.f32 %v404_v11, %v353_v28  ;;  %v428_v14 = vadd.f32 %v427_v12, %v353_v28 }
  0xb6   : > { %v547_v15 = vpack.c.bf16 %v528_v10, %v505_v9 }
  0xb7   : > { %v538_v16 = vpack.c.bf16 %v428_v14, %v405_v13 }
  0xb8   : > { %552 = vst [vmem:[%s918_s26 + $0x18] sm:$0xff] %v547_v15 }
  0xb9   : > { %543 = vst [vmem:[%s912_s20 + $0x20] sm:$0x33] %v538_v16 }
  0xbb   : > { %v507_v18 = vpop.f32.mrf.mxu2  ;;  %v530_v19 = vpop.f32.mrf.mxu3 }
  0xbc   : > { %v508_v20 = vadd.f32 %v507_v18, %v464_v17  ;;  %v531_v21 = vadd.f32 %v530_v19, %v464_v17  ;;  %v406_v22 = vpop.f32.mrf.mxu0  ;;  %v429_v23 = vpop.f32.mrf.mxu1 }
  0xbe   : > { %v548_v24 = vpack.c.bf16 %v531_v21, %v508_v20 }
  0xc0   : > { %553 = vst [vmem:[%s918_s26 + $0x20] sm:$0x33] %v548_v24 }
  0xc3   : > { %v509_v25 = vpop.f32.mrf.mxu2  ;;  %v532_v26 = vpop.f32.mrf.mxu3 }
  0xc4 PF: > { %s17_s23 = sadd.s32 1, %s786_s23   ;;  %s945_s21 = smov %s782_s22 }
  0xc5   : > { %p14_p5 = scmp.ge.s32.totalorder %s17_s23, 4   ;;  %s946_s22 = smov %s948_s24 }
  0xc7   :  { %16 = sbr.rel (!%p14_p5) target bundleno = 2 (0x2), region = 82 }

</bundles_post_ra>
